<compile_context>
chip_gen: v6e
topology: v6e:2x2x1
jax: 0.10.0
libtpu: 0.0.40
codegen_flags: <defaults>
</compile_context>

<pallas_src>
import functools

import jax
import jax.numpy as jnp
from jax import lax
from jax.experimental import pallas as pl
from jax.experimental.pallas import tpu as pltpu

_EPS = 1e-5


def _stn_kernel(x_ref, w1_ref, w2_ref, g1_ref, be1_ref, g2_ref, be2_ref,
                w3_ref, b3e_ref, out_ref,
                sum1_ref, sq1_ref, sum2_ref, sq2_ref, mx2_ref, mn2_ref,
                *, inv_count):
    phase = pl.program_id(0)          # 0: BN1 stats pass, 1: compute pass
    tile = pl.program_id(1)
    n_tiles = pl.num_programs(1)

    B, n_t, c = x_ref.shape
    # Flatten to 2-D so both convs are plain (M, K) @ (K, N) MXU matmuls.
    x2d = x_ref[...].reshape(B * n_t, c)

    # ---------------- phase 0: conv1 + accumulate BN1 batch statistics -------
    @pl.when(phase == 0)
    def _pass1_stats():
        @pl.when(tile == 0)
        def _init():
            sum1_ref[...] = jnp.zeros_like(sum1_ref)
            sq1_ref[...] = jnp.zeros_like(sq1_ref)

        h1 = jnp.dot(x2d, w1_ref[...], preferred_element_type=jnp.float32)   # (B*Nt, 64)
        sum1_ref[...] += jnp.sum(h1, axis=0, keepdims=True)
        sq1_ref[...] += jnp.sum(h1 * h1, axis=0, keepdims=True)

    # ---------------- phase 1: BN1+ReLU, conv2, streaming pool + BN2 stats ---
    @pl.when(phase == 1)
    def _pass2_compute():
        @pl.when(tile == 0)
        def _init():
            sum2_ref[...] = jnp.zeros_like(sum2_ref)
            sq2_ref[...] = jnp.zeros_like(sq2_ref)
            mx2_ref[...] = jnp.full(mx2_ref.shape, -jnp.inf, mx2_ref.dtype)
            mn2_ref[...] = jnp.full(mn2_ref.shape, jnp.inf, mn2_ref.dtype)

        # BN1 as a per-channel affine (conv bias b1 cancels exactly).
        mean1 = sum1_ref[...] * inv_count                              # (1, 64)
        var1 = sq1_ref[...] * inv_count - mean1 * mean1
        sc1 = g1_ref[...] * lax.rsqrt(var1 + _EPS)
        sh1 = be1_ref[...] - mean1 * sc1

        # Recompute conv1 for this tile (K=c is tiny; cheaper than stashing h1).
        h1 = jnp.dot(x2d, w1_ref[...], preferred_element_type=jnp.float32)   # (B*Nt, 64)
        a1 = jnp.maximum(h1 * sc1 + sh1, 0.0)

        h2 = jnp.dot(a1, w2_ref[...], preferred_element_type=jnp.float32)    # (B*Nt, 256)

        # Streaming BN2 stats + per-batch channel max/min of the raw conv2 out.
        sum2_ref[...] += jnp.sum(h2, axis=0, keepdims=True)
        sq2_ref[...] += jnp.sum(h2 * h2, axis=0, keepdims=True)
        h2b = h2.reshape(B, n_t, h2.shape[-1])
        mx2_ref[...] = jnp.maximum(mx2_ref[...], jnp.max(h2b, axis=1))
        mn2_ref[...] = jnp.minimum(mn2_ref[...], jnp.min(h2b, axis=1))

        @pl.when(tile == n_tiles - 1)
        def _finalize():
            # BN2 affine; ReLU + global max commute with it (min covers gamma<0).
            mean2 = sum2_ref[...] * inv_count                          # (1, 256)
            var2 = sq2_ref[...] * inv_count - mean2 * mean2
            sc2 = g2_ref[...] * lax.rsqrt(var2 + _EPS)
            sh2 = be2_ref[...] - mean2 * sc2

            pooled_raw = jnp.where(sc2 > 0.0, mx2_ref[...], mn2_ref[...])    # (B, 256)
            pooled = jnp.maximum(pooled_raw * sc2 + sh2, 0.0)

            y = jnp.dot(pooled, w3_ref[...], preferred_element_type=jnp.float32)
            out_ref[...] = y + b3e_ref[...]        # b3 + flattened identity


def _pick_n_tile(n):
    # Whole axis for small N; otherwise the largest 128-multiple tile dividing N
    # (BlockSpec last-two-dims rule + exact BN element counts, no masking).
    if n <= 1024:
        return n
    for cand in (1024, 512, 256, 128):
        if n % cand == 0:
            return cand
    return n


def stnkd_forward(x, params, c):
    """x: (B, c, N) float32 (PyTorch NCW).  Returns (B, c, c)."""
    B, c_in, N = x.shape
    assert c_in == c
    assert N % 8 == 0, "kernel assumes the points axis is a multiple of 8"

    # Layout glue (smallest tensor): (B, c, N) -> (B, N, c) so every in-kernel
    # contraction is a plain 2-D matmul with M = B*N.
    x_t = jnp.transpose(x, (0, 2, 1))

    n_tile = _pick_n_tile(N)
    assert N % n_tile == 0
    n_tiles = N // n_tile

    # Fold fc3 bias and the identity into a single bias vector.
    b3e = params["b3"] + jnp.eye(c, dtype=jnp.float32).reshape(1, c * c)

    const = lambda p, t: (0, 0)
    grid_spec = pltpu.PrefetchScalarGridSpec(
        num_scalar_prefetch=0,
        grid=(2, n_tiles),                         # (phase, points-tile)
        in_specs=[
            pl.BlockSpec((B, n_tile, c), lambda p, t: (0, t, 0)),   # x
            pl.BlockSpec((c, 64), const),                            # w1t
            pl.BlockSpec((64, 256), const),                          # w2t
            pl.BlockSpec((1, 64), const),                            # gamma1
            pl.BlockSpec((1, 64), const),                            # beta1
            pl.BlockSpec((1, 256), const),                           # gamma2
            pl.BlockSpec((1, 256), const),                           # beta2
            pl.BlockSpec((256, c * c), const),                       # w3t
            pl.BlockSpec((1, c * c), const),                         # b3 + eye
        ],
        out_specs=pl.BlockSpec((B, c * c), const),
        scratch_shapes=[
            pltpu.VMEM((1, 64), jnp.float32),     # sum1
            pltpu.VMEM((1, 64), jnp.float32),     # sumsq1
            pltpu.VMEM((1, 256), jnp.float32),    # sum2
            pltpu.VMEM((1, 256), jnp.float32),    # sumsq2
            pltpu.VMEM((B, 256), jnp.float32),    # per-batch channel max
            pltpu.VMEM((B, 256), jnp.float32),    # per-batch channel min
        ],
    )

    kernel = functools.partial(_stn_kernel, inv_count=1.0 / float(B * N))

    out = pl.pallas_call(
        kernel,
        out_shape=jax.ShapeDtypeStruct((B, c * c), jnp.float32),
        grid_spec=grid_spec,
        compiler_params=pltpu.CompilerParams(
            dimension_semantics=("arbitrary", "arbitrary"),
            vmem_limit_bytes=48 * 1024 * 1024,
        ),
    )(x_t, params["w1t"], params["w2t"], params["g1"], params["be1"],
      params["g2"], params["be2"], params["w3t"], b3e)

    return out.reshape(B, c, c)


def init_params(key, c):
    """Deterministic synthetic parameters matching STNkD.__init__ shapes.
    Conv / fc weights are stored pre-transposed (in, out) for the (.., C) layout."""
    ks = jax.random.split(key, 6)
    p = {
        # conv1: torch weight (64, c, 1) -> (c, 64)
        "w1t": 0.1 * jax.random.normal(ks[0], (c, 64), jnp.float32),
        "b1":  0.1 * jax.random.normal(ks[1], (1, 64), jnp.float32),
        # conv2: torch weight (256, 64, 1) -> (64, 256)
        "w2t": 0.1 * jax.random.normal(ks[2], (64, 256), jnp.float32),
        "b2":  0.1 * jax.random.normal(ks[3], (1, 256), jnp.float32),
        # fc3: torch weight (c*c, 256) -> (256, c*c)
        "w3t": 0.1 * jax.random.normal(ks[4], (256, c * c), jnp.float32),
        "b3":  0.1 * jax.random.normal(ks[5], (1, c * c), jnp.float32),
        # BatchNorm affine params (torch defaults: weight=1, bias=0)
        "g1":  jnp.ones((1, 64), jnp.float32),
        "be1": jnp.zeros((1, 64), jnp.float32),
        "g2":  jnp.ones((1, 256), jnp.float32),
        "be2": jnp.zeros((1, 256), jnp.float32),
    }
    return p


def stnkd_reference(x, params, c):
    """Pure-JAX reference (training-mode BatchNorm, matching a fresh torch module).
    Keeps the conv biases and two-pass variance, so it also validates the
    kernel's bias-cancellation and BN/ReLU/max commutation."""
    x_t = jnp.transpose(x, (0, 2, 1))
    h1 = jnp.einsum("bnc,co->bno", x_t, params["w1t"]) + params["b1"]
    m1 = jnp.mean(h1, axis=(0, 1), keepdims=True)
    v1 = jnp.mean((h1 - m1) ** 2, axis=(0, 1), keepdims=True)
    h1 = jnp.maximum((h1 - m1) / jnp.sqrt(v1 + _EPS) * params["g1"] + params["be1"], 0.0)
    h2 = jnp.einsum("bno,op->bnp", h1, params["w2t"]) + params["b2"]
    m2 = jnp.mean(h2, axis=(0, 1), keepdims=True)
    v2 = jnp.mean((h2 - m2) ** 2, axis=(0, 1), keepdims=True)
    h2 = jnp.maximum((h2 - m2) / jnp.sqrt(v2 + _EPS) * params["g2"] + params["be2"], 0.0)
    pooled = jnp.max(h2, axis=1)
    y = pooled @ params["w3t"] + params["b3"]
    y = y + jnp.eye(c, dtype=jnp.float32).reshape(1, c * c)
    return y.reshape(x.shape[0], c, c)


if __name__ == "__main__":
    B, c, N = 2, 4, 16
    key = jax.random.PRNGKey(0)
    kx, kp = jax.random.split(key)
    x = jax.random.normal(kx, (B, c, N), jnp.float32)
    params = init_params(kp, c)

    out = stnkd_forward(x, params, c)
    out = jax.block_until_ready(out)

    ref = stnkd_reference(x, params, c)
    assert out.shape == (B, c, c)
    assert jnp.allclose(out, ref, atol=1e-4, rtol=1e-4)
    print("KERNEL_OK")
</pallas_src>

<mosaic_0001>
module attributes {stable_mosaic.version = 11 : i64} {
  func.func @_stn_kernel(%arg0: i32, %arg1: i32, %arg2: memref<2x16x4xf32, #tpu.memory_space<vmem>>, %arg3: memref<4x64xf32, #tpu.memory_space<vmem>>, %arg4: memref<64x256xf32, #tpu.memory_space<vmem>>, %arg5: memref<1x64xf32, #tpu.memory_space<vmem>>, %arg6: memref<1x64xf32, #tpu.memory_space<vmem>>, %arg7: memref<1x256xf32, #tpu.memory_space<vmem>>, %arg8: memref<1x256xf32, #tpu.memory_space<vmem>>, %arg9: memref<256x16xf32, #tpu.memory_space<vmem>>, %arg10: memref<1x16xf32, #tpu.memory_space<vmem>>, %arg11: memref<2x16xf32, #tpu.memory_space<vmem>>, %arg12: memref<1x64xf32, #tpu.memory_space<vmem>>, %arg13: memref<1x64xf32, #tpu.memory_space<vmem>>, %arg14: memref<1x256xf32, #tpu.memory_space<vmem>>, %arg15: memref<1x256xf32, #tpu.memory_space<vmem>>, %arg16: memref<2x256xf32, #tpu.memory_space<vmem>>, %arg17: memref<2x256xf32, #tpu.memory_space<vmem>>) attributes {dimension_semantics = [#tpu.dimension_semantics<arbitrary>, #tpu.dimension_semantics<arbitrary>], iteration_bounds = array<i64: 2, 1>, scalar_prefetch = 0 : i64, scratch_operands = 6 : i64, tpu.core_type = #tpu.core_type<tc>, window_params = [{transform_indices = @transform_0, window_bounds = array<i64: 2, 16, 4>}, {pipeline_mode = #tpu.pipeline_mode<synchronous>, transform_indices = @transform_1, window_bounds = array<i64: 4, 64>}, {pipeline_mode = #tpu.pipeline_mode<synchronous>, transform_indices = @transform_2, window_bounds = array<i64: 64, 256>}, {pipeline_mode = #tpu.pipeline_mode<synchronous>, transform_indices = @transform_3, window_bounds = array<i64: 1, 64>}, {pipeline_mode = #tpu.pipeline_mode<synchronous>, transform_indices = @transform_4, window_bounds = array<i64: 1, 64>}, {pipeline_mode = #tpu.pipeline_mode<synchronous>, transform_indices = @transform_5, window_bounds = array<i64: 1, 256>}, {pipeline_mode = #tpu.pipeline_mode<synchronous>, transform_indices = @transform_6, window_bounds = array<i64: 1, 256>}, {pipeline_mode = #tpu.pipeline_mode<synchronous>, transform_indices = @transform_7, window_bounds = array<i64: 256, 16>}, {pipeline_mode = #tpu.pipeline_mode<synchronous>, transform_indices = @transform_8, window_bounds = array<i64: 1, 16>}, {pipeline_mode = #tpu.pipeline_mode<synchronous>, transform_indices = @transform_9, window_bounds = array<i64: 2, 16>}]} {
    %c0 = arith.constant 0 : index
    %c0_0 = arith.constant 0 : index
    %c0_1 = arith.constant 0 : index
    %0 = vector.load %arg2[%c0, %c0_0, %c0_1] : memref<2x16x4xf32, #tpu.memory_space<vmem>>, vector<2x16x4xf32>
    %1 = vector.shape_cast %0 : vector<2x16x4xf32> to vector<32x4xf32>
    %c0_i32 = arith.constant 0 : i32
    %2 = arith.cmpi eq, %arg0, %c0_i32 : i32
    %3 = arith.extui %2 : i1 to i32
    %c0_i32_2 = arith.constant 0 : i32
    %4 = arith.cmpi ne, %3, %c0_i32_2 : i32
    scf.if %4 {
      %c0_i32_4 = arith.constant 0 : i32
      %8 = arith.cmpi eq, %arg1, %c0_i32_4 : i32
      %9 = arith.extui %8 : i1 to i32
      %c0_i32_5 = arith.constant 0 : i32
      %10 = arith.cmpi ne, %9, %c0_i32_5 : i32
      scf.if %10 {
        %cst_18 = arith.constant 0.000000e+00 : f32
        %24 = vector.broadcast %cst_18 : f32 to vector<1x64xf32>
        %c0_19 = arith.constant 0 : index
        %c0_20 = arith.constant 0 : index
        %25 = vector.load %arg12[%c0_19, %c0_20] : memref<1x64xf32, #tpu.memory_space<vmem>>, vector<1x64xf32>
        tpu.vector_store %arg12[%c0_19, %c0_20], %24 {strides = array<i32>} : memref<1x64xf32, #tpu.memory_space<vmem>>, vector<1x64xf32>,
        %cst_21 = arith.constant 0.000000e+00 : f32
        %26 = vector.broadcast %cst_21 : f32 to vector<1x64xf32>
        %c0_22 = arith.constant 0 : index
        %c0_23 = arith.constant 0 : index
        %27 = vector.load %arg13[%c0_22, %c0_23] : memref<1x64xf32, #tpu.memory_space<vmem>>, vector<1x64xf32>
        tpu.vector_store %arg13[%c0_22, %c0_23], %26 {strides = array<i32>} : memref<1x64xf32, #tpu.memory_space<vmem>>, vector<1x64xf32>,
      } else {
      }
      %c0_6 = arith.constant 0 : index
      %c0_7 = arith.constant 0 : index
      %11 = vector.load %arg3[%c0_6, %c0_7] : memref<4x64xf32, #tpu.memory_space<vmem>>, vector<4x64xf32>
      %cst = arith.constant dense<0.000000e+00> : vector<32x64xf32>
      %12 = tpu.matmul %1, %11, %cst {dimension_numbers = #tpu.dot_dimension_numbers<[1], [0], [0], [1], [0, 0, 1, 1], [], []>} : vector<32x4xf32>, vector<4x64xf32>, vector<32x64xf32> -> vector<32x64xf32>
      %c0_8 = arith.constant 0 : index
      %c0_9 = arith.constant 0 : index
      %13 = vector.load %arg12[%c0_8, %c0_9] : memref<1x64xf32, #tpu.memory_space<vmem>>, vector<1x64xf32>
      %cst_10 = arith.constant dense<0.000000e+00> : vector<64xf32>
      %14 = vector.multi_reduction <add>, %12, %cst_10 [0] : vector<32x64xf32> to vector<64xf32>
      %15 = vector.shape_cast %14 : vector<64xf32> to vector<1x64xf32>
      %16 = arith.addf %13, %15 : vector<1x64xf32>
      %c0_11 = arith.constant 0 : index
      %c0_12 = arith.constant 0 : index
      %17 = vector.load %arg12[%c0_11, %c0_12] : memref<1x64xf32, #tpu.memory_space<vmem>>, vector<1x64xf32>
      tpu.vector_store %arg12[%c0_11, %c0_12], %16 {strides = array<i32>} : memref<1x64xf32, #tpu.memory_space<vmem>>, vector<1x64xf32>,
      %c0_13 = arith.constant 0 : index
      %c0_14 = arith.constant 0 : index
      %18 = vector.load %arg13[%c0_13, %c0_14] : memref<1x64xf32, #tpu.memory_space<vmem>>, vector<1x64xf32>
      %19 = arith.mulf %12, %12 : vector<32x64xf32>
      %cst_15 = arith.constant dense<0.000000e+00> : vector<64xf32>
      %20 = vector.multi_reduction <add>, %19, %cst_15 [0] : vector<32x64xf32> to vector<64xf32>
      %21 = vector.shape_cast %20 : vector<64xf32> to vector<1x64xf32>
      %22 = arith.addf %18, %21 : vector<1x64xf32>
      %c0_16 = arith.constant 0 : index
      %c0_17 = arith.constant 0 : index
      %23 = vector.load %arg13[%c0_16, %c0_17] : memref<1x64xf32, #tpu.memory_space<vmem>>, vector<1x64xf32>
      tpu.vector_store %arg13[%c0_16, %c0_17], %22 {strides = array<i32>} : memref<1x64xf32, #tpu.memory_space<vmem>>, vector<1x64xf32>,
    } else {
    }
    %c1_i32 = arith.constant 1 : i32
    %5 = arith.cmpi eq, %arg0, %c1_i32 : i32
    %6 = arith.extui %5 : i1 to i32
    %c0_i32_3 = arith.constant 0 : i32
    %7 = arith.cmpi ne, %6, %c0_i32_3 : i32
    scf.if %7 {
      %c0_i32_4 = arith.constant 0 : i32
      %8 = arith.cmpi eq, %arg1, %c0_i32_4 : i32
      %9 = arith.extui %8 : i1 to i32
      %c0_i32_5 = arith.constant 0 : i32
      %10 = arith.cmpi ne, %9, %c0_i32_5 : i32
      scf.if %10 {
        %cst_45 = arith.constant 0.000000e+00 : f32
        %60 = vector.broadcast %cst_45 : f32 to vector<1x256xf32>
        %c0_46 = arith.constant 0 : index
        %c0_47 = arith.constant 0 : index
        %61 = vector.load %arg14[%c0_46, %c0_47] : memref<1x256xf32, #tpu.memory_space<vmem>>, vector<1x256xf32>
        tpu.vector_store %arg14[%c0_46, %c0_47], %60 {strides = array<i32>} : memref<1x256xf32, #tpu.memory_space<vmem>>, vector<1x256xf32>,
        %cst_48 = arith.constant 0.000000e+00 : f32
        %62 = vector.broadcast %cst_48 : f32 to vector<1x256xf32>
        %c0_49 = arith.constant 0 : index
        %c0_50 = arith.constant 0 : index
        %63 = vector.load %arg15[%c0_49, %c0_50] : memref<1x256xf32, #tpu.memory_space<vmem>>, vector<1x256xf32>
        tpu.vector_store %arg15[%c0_49, %c0_50], %62 {strides = array<i32>} : memref<1x256xf32, #tpu.memory_space<vmem>>, vector<1x256xf32>,
        %cst_51 = arith.constant 0xFF800000 : f32
        %64 = vector.broadcast %cst_51 : f32 to vector<2x256xf32>
        %c0_52 = arith.constant 0 : index
        %c0_53 = arith.constant 0 : index
        %65 = vector.load %arg16[%c0_52, %c0_53] : memref<2x256xf32, #tpu.memory_space<vmem>>, vector<2x256xf32>
        tpu.vector_store %arg16[%c0_52, %c0_53], %64 {strides = array<i32>} : memref<2x256xf32, #tpu.memory_space<vmem>>, vector<2x256xf32>,
        %cst_54 = arith.constant 0x7F800000 : f32
        %66 = vector.broadcast %cst_54 : f32 to vector<2x256xf32>
        %c0_55 = arith.constant 0 : index
        %c0_56 = arith.constant 0 : index
        %67 = vector.load %arg17[%c0_55, %c0_56] : memref<2x256xf32, #tpu.memory_space<vmem>>, vector<2x256xf32>
        tpu.vector_store %arg17[%c0_55, %c0_56], %66 {strides = array<i32>} : memref<2x256xf32, #tpu.memory_space<vmem>>, vector<2x256xf32>,
      } else {
      }
      %c0_6 = arith.constant 0 : index
      %c0_7 = arith.constant 0 : index
      %11 = vector.load %arg12[%c0_6, %c0_7] : memref<1x64xf32, #tpu.memory_space<vmem>>, vector<1x64xf32>
      %cst = arith.constant 3.125000e-02 : f32
      %12 = vector.broadcast %cst : f32 to vector<1x64xf32>
      %13 = arith.mulf %11, %12 : vector<1x64xf32>
      %c0_8 = arith.constant 0 : index
      %c0_9 = arith.constant 0 : index
      %14 = vector.load %arg13[%c0_8, %c0_9] : memref<1x64xf32, #tpu.memory_space<vmem>>, vector<1x64xf32>
      %cst_10 = arith.constant 3.125000e-02 : f32
      %15 = vector.broadcast %cst_10 : f32 to vector<1x64xf32>
      %16 = arith.mulf %14, %15 : vector<1x64xf32>
      %17 = arith.mulf %13, %13 : vector<1x64xf32>
      %18 = arith.subf %16, %17 : vector<1x64xf32>
      %c0_11 = arith.constant 0 : index
      %c0_12 = arith.constant 0 : index
      %19 = vector.load %arg5[%c0_11, %c0_12] : memref<1x64xf32, #tpu.memory_space<vmem>>, vector<1x64xf32>
      %cst_13 = arith.constant 9.99999974E-6 : f32
      %20 = vector.broadcast %cst_13 : f32 to vector<1x64xf32>
      %21 = arith.addf %18, %20 : vector<1x64xf32>
      %22 = math.rsqrt %21 : vector<1x64xf32>
      %23 = arith.mulf %19, %22 : vector<1x64xf32>
      %c0_14 = arith.constant 0 : index
      %c0_15 = arith.constant 0 : index
      %24 = vector.load %arg6[%c0_14, %c0_15] : memref<1x64xf32, #tpu.memory_space<vmem>>, vector<1x64xf32>
      %25 = arith.mulf %13, %23 : vector<1x64xf32>
      %26 = arith.subf %24, %25 : vector<1x64xf32>
      %c0_16 = arith.constant 0 : index
      %c0_17 = arith.constant 0 : index
      %27 = vector.load %arg3[%c0_16, %c0_17] : memref<4x64xf32, #tpu.memory_space<vmem>>, vector<4x64xf32>
      %cst_18 = arith.constant dense<0.000000e+00> : vector<32x64xf32>
      %28 = tpu.matmul %1, %27, %cst_18 {dimension_numbers = #tpu.dot_dimension_numbers<[1], [0], [0], [1], [0, 0, 1, 1], [], []>} : vector<32x4xf32>, vector<4x64xf32>, vector<32x64xf32> -> vector<32x64xf32>
      %29 = vector.broadcast %23 : vector<1x64xf32> to vector<32x64xf32>
      %30 = arith.mulf %28, %29 : vector<32x64xf32>
      %31 = vector.broadcast %26 : vector<1x64xf32> to vector<32x64xf32>
      %32 = arith.addf %30, %31 : vector<32x64xf32>
      %cst_19 = arith.constant 0.000000e+00 : f32
      %33 = vector.broadcast %cst_19 : f32 to vector<32x64xf32>
      %34 = arith.maximumf %32, %33 : vector<32x64xf32>
      %c0_20 = arith.constant 0 : index
      %c0_21 = arith.constant 0 : index
      %35 = vector.load %arg4[%c0_20, %c0_21] : memref<64x256xf32, #tpu.memory_space<vmem>>, vector<64x256xf32>
      %cst_22 = arith.constant dense<0.000000e+00> : vector<32x256xf32>
      %36 = tpu.matmul %34, %35, %cst_22 {dimension_numbers = #tpu.dot_dimension_numbers<[1], [0], [0], [1], [0, 0, 1, 1], [], []>} : vector<32x64xf32>, vector<64x256xf32>, vector<32x256xf32> -> vector<32x256xf32>
      %c0_23 = arith.constant 0 : index
      %c0_24 = arith.constant 0 : index
      %37 = vector.load %arg14[%c0_23, %c0_24] : memref<1x256xf32, #tpu.memory_space<vmem>>, vector<1x256xf32>
      %cst_25 = arith.constant dense<0.000000e+00> : vector<256xf32>
      %38 = vector.multi_reduction <add>, %36, %cst_25 [0] : vector<32x256xf32> to vector<256xf32>
      %39 = vector.shape_cast %38 : vector<256xf32> to vector<1x256xf32>
      %40 = arith.addf %37, %39 : vector<1x256xf32>
      %c0_26 = arith.constant 0 : index
      %c0_27 = arith.constant 0 : index
      %41 = vector.load %arg14[%c0_26, %c0_27] : memref<1x256xf32, #tpu.memory_space<vmem>>, vector<1x256xf32>
      tpu.vector_store %arg14[%c0_26, %c0_27], %40 {strides = array<i32>} : memref<1x256xf32, #tpu.memory_space<vmem>>, vector<1x256xf32>,
      %c0_28 = arith.constant 0 : index
      %c0_29 = arith.constant 0 : index
      %42 = vector.load %arg15[%c0_28, %c0_29] : memref<1x256xf32, #tpu.memory_space<vmem>>, vector<1x256xf32>
      %43 = arith.mulf %36, %36 : vector<32x256xf32>
      %cst_30 = arith.constant dense<0.000000e+00> : vector<256xf32>
      %44 = vector.multi_reduction <add>, %43, %cst_30 [0] : vector<32x256xf32> to vector<256xf32>
      %45 = vector.shape_cast %44 : vector<256xf32> to vector<1x256xf32>
      %46 = arith.addf %42, %45 : vector<1x256xf32>
      %c0_31 = arith.constant 0 : index
      %c0_32 = arith.constant 0 : index
      %47 = vector.load %arg15[%c0_31, %c0_32] : memref<1x256xf32, #tpu.memory_space<vmem>>, vector<1x256xf32>
      tpu.vector_store %arg15[%c0_31, %c0_32], %46 {strides = array<i32>} : memref<1x256xf32, #tpu.memory_space<vmem>>, vector<1x256xf32>,
      %48 = vector.shape_cast %36 : vector<32x256xf32> to vector<2x16x256xf32>
      %c0_33 = arith.constant 0 : index
      %c0_34 = arith.constant 0 : index
      %49 = vector.load %arg16[%c0_33, %c0_34] : memref<2x256xf32, #tpu.memory_space<vmem>>, vector<2x256xf32>
      %cst_35 = arith.constant dense<0xFF800000> : vector<2x256xf32>
      %50 = vector.multi_reduction <maximumf>, %48, %cst_35 [1] : vector<2x16x256xf32> to vector<2x256xf32>
      %51 = arith.maximumf %49, %50 : vector<2x256xf32>
      %c0_36 = arith.constant 0 : index
      %c0_37 = arith.constant 0 : index
      %52 = vector.load %arg16[%c0_36, %c0_37] : memref<2x256xf32, #tpu.memory_space<vmem>>, vector<2x256xf32>
      tpu.vector_store %arg16[%c0_36, %c0_37], %51 {strides = array<i32>} : memref<2x256xf32, #tpu.memory_space<vmem>>, vector<2x256xf32>,
      %c0_38 = arith.constant 0 : index
      %c0_39 = arith.constant 0 : index
      %53 = vector.load %arg17[%c0_38, %c0_39] : memref<2x256xf32, #tpu.memory_space<vmem>>, vector<2x256xf32>
      %cst_40 = arith.constant dense<0x7F800000> : vector<2x256xf32>
      %54 = vector.multi_reduction <minimumf>, %48, %cst_40 [1] : vector<2x16x256xf32> to vector<2x256xf32>
      %55 = arith.minimumf %53, %54 : vector<2x256xf32>
      %c0_41 = arith.constant 0 : index
      %c0_42 = arith.constant 0 : index
      %56 = vector.load %arg17[%c0_41, %c0_42] : memref<2x256xf32, #tpu.memory_space<vmem>>, vector<2x256xf32>
      tpu.vector_store %arg17[%c0_41, %c0_42], %55 {strides = array<i32>} : memref<2x256xf32, #tpu.memory_space<vmem>>, vector<2x256xf32>,
      %c0_i32_43 = arith.constant 0 : i32
      %57 = arith.cmpi eq, %arg1, %c0_i32_43 : i32
      %58 = arith.extui %57 : i1 to i32
      %c0_i32_44 = arith.constant 0 : i32
      %59 = arith.cmpi ne, %58, %c0_i32_44 : i32
      scf.if %59 {
        %c0_45 = arith.constant 0 : index
        %c0_46 = arith.constant 0 : index
        %60 = vector.load %arg14[%c0_45, %c0_46] : memref<1x256xf32, #tpu.memory_space<vmem>>, vector<1x256xf32>
        %cst_47 = arith.constant 3.125000e-02 : f32
        %61 = vector.broadcast %cst_47 : f32 to vector<1x256xf32>
        %62 = arith.mulf %60, %61 : vector<1x256xf32>
        %c0_48 = arith.constant 0 : index
        %c0_49 = arith.constant 0 : index
        %63 = vector.load %arg15[%c0_48, %c0_49] : memref<1x256xf32, #tpu.memory_space<vmem>>, vector<1x256xf32>
        %cst_50 = arith.constant 3.125000e-02 : f32
        %64 = vector.broadcast %cst_50 : f32 to vector<1x256xf32>
        %65 = arith.mulf %63, %64 : vector<1x256xf32>
        %66 = arith.mulf %62, %62 : vector<1x256xf32>
        %67 = arith.subf %65, %66 : vector<1x256xf32>
        %c0_51 = arith.constant 0 : index
        %c0_52 = arith.constant 0 : index
        %68 = vector.load %arg7[%c0_51, %c0_52] : memref<1x256xf32, #tpu.memory_space<vmem>>, vector<1x256xf32>
        %cst_53 = arith.constant 9.99999974E-6 : f32
        %69 = vector.broadcast %cst_53 : f32 to vector<1x256xf32>
        %70 = arith.addf %67, %69 : vector<1x256xf32>
        %71 = math.rsqrt %70 : vector<1x256xf32>
        %72 = arith.mulf %68, %71 : vector<1x256xf32>
        %c0_54 = arith.constant 0 : index
        %c0_55 = arith.constant 0 : index
        %73 = vector.load %arg8[%c0_54, %c0_55] : memref<1x256xf32, #tpu.memory_space<vmem>>, vector<1x256xf32>
        %74 = arith.mulf %62, %72 : vector<1x256xf32>
        %75 = arith.subf %73, %74 : vector<1x256xf32>
        %cst_56 = arith.constant 0.000000e+00 : f32
        %76 = vector.broadcast %cst_56 : f32 to vector<1x256xf32>
        %77 = arith.cmpf ogt, %72, %76 : vector<1x256xf32>
        %c0_57 = arith.constant 0 : index
        %c0_58 = arith.constant 0 : index
        %78 = vector.load %arg16[%c0_57, %c0_58] : memref<2x256xf32, #tpu.memory_space<vmem>>, vector<2x256xf32>
        %c0_59 = arith.constant 0 : index
        %c0_60 = arith.constant 0 : index
        %79 = vector.load %arg17[%c0_59, %c0_60] : memref<2x256xf32, #tpu.memory_space<vmem>>, vector<2x256xf32>
        %80 = vector.shape_cast %77 : vector<1x256xi1> to vector<1x256xi1>
        %81 = vector.broadcast %80 : vector<1x256xi1> to vector<2x256xi1>
        %82 = arith.select %81, %78, %79 : vector<2x256xi1>, vector<2x256xf32>
        %83 = vector.broadcast %72 : vector<1x256xf32> to vector<2x256xf32>
        %84 = arith.mulf %82, %83 : vector<2x256xf32>
        %85 = vector.broadcast %75 : vector<1x256xf32> to vector<2x256xf32>
        %86 = arith.addf %84, %85 : vector<2x256xf32>
        %cst_61 = arith.constant 0.000000e+00 : f32
        %87 = vector.broadcast %cst_61 : f32 to vector<2x256xf32>
        %88 = arith.maximumf %86, %87 : vector<2x256xf32>
        %c0_62 = arith.constant 0 : index
        %c0_63 = arith.constant 0 : index
        %89 = vector.load %arg9[%c0_62, %c0_63] : memref<256x16xf32, #tpu.memory_space<vmem>>, vector<256x16xf32>
        %cst_64 = arith.constant dense<0.000000e+00> : vector<2x16xf32>
        %90 = tpu.matmul %88, %89, %cst_64 {dimension_numbers = #tpu.dot_dimension_numbers<[1], [0], [0], [1], [0, 0, 1, 1], [], []>} : vector<2x256xf32>, vector<256x16xf32>, vector<2x16xf32> -> vector<2x16xf32>
        %c0_65 = arith.constant 0 : index
        %c0_66 = arith.constant 0 : index
        %91 = vector.load %arg10[%c0_65, %c0_66] : memref<1x16xf32, #tpu.memory_space<vmem>>, vector<1x16xf32>
        %92 = vector.broadcast %91 : vector<1x16xf32> to vector<2x16xf32>
        %93 = arith.addf %90, %92 : vector<2x16xf32>
        %c0_67 = arith.constant 0 : index
        %c0_68 = arith.constant 0 : index
        %94 = vector.load %arg11[%c0_67, %c0_68] : memref<2x16xf32, #tpu.memory_space<vmem>>, vector<2x16xf32>
        tpu.vector_store %arg11[%c0_67, %c0_68], %93 {strides = array<i32>} : memref<2x16xf32, #tpu.memory_space<vmem>>, vector<2x16xf32>,
      } else {
      }
    } else {
    }
    return
  }
  func.func @transform_0(%arg0: i32, %arg1: i32) -> (i32, i32, i32) {
    %c0_i32 = arith.constant 0 : i32
    %c0_i32_0 = arith.constant 0 : i32
    %c0_i32_1 = arith.constant 0 : i32
    return %c0_i32, %arg1, %c0_i32_0 : i32, i32, i32
  }
  func.func @transform_1(%arg0: i32, %arg1: i32) -> (i32, i32) {
    %c0_i32 = arith.constant 0 : i32
    %c0_i32_0 = arith.constant 0 : i32
    %c0_i32_1 = arith.constant 0 : i32
    return %c0_i32, %c0_i32_0 : i32, i32
  }
  func.func @transform_2(%arg0: i32, %arg1: i32) -> (i32, i32) {
    %c0_i32 = arith.constant 0 : i32
    %c0_i32_0 = arith.constant 0 : i32
    %c0_i32_1 = arith.constant 0 : i32
    return %c0_i32, %c0_i32_0 : i32, i32
  }
  func.func @transform_3(%arg0: i32, %arg1: i32) -> (i32, i32) {
    %c0_i32 = arith.constant 0 : i32
    %c0_i32_0 = arith.constant 0 : i32
    %c0_i32_1 = arith.constant 0 : i32
    return %c0_i32, %c0_i32_0 : i32, i32
  }
  func.func @transform_4(%arg0: i32, %arg1: i32) -> (i32, i32) {
    %c0_i32 = arith.constant 0 : i32
    %c0_i32_0 = arith.constant 0 : i32
    %c0_i32_1 = arith.constant 0 : i32
    return %c0_i32, %c0_i32_0 : i32, i32
  }
  func.func @transform_5(%arg0: i32, %arg1: i32) -> (i32, i32) {
    %c0_i32 = arith.constant 0 : i32
    %c0_i32_0 = arith.constant 0 : i32
    %c0_i32_1 = arith.constant 0 : i32
    return %c0_i32, %c0_i32_0 : i32, i32
  }
  func.func @transform_6(%arg0: i32, %arg1: i32) -> (i32, i32) {
    %c0_i32 = arith.constant 0 : i32
    %c0_i32_0 = arith.constant 0 : i32
    %c0_i32_1 = arith.constant 0 : i32
    return %c0_i32, %c0_i32_0 : i32, i32
  }
  func.func @transform_7(%arg0: i32, %arg1: i32) -> (i32, i32) {
    %c0_i32 = arith.constant 0 : i32
    %c0_i32_0 = arith.constant 0 : i32
    %c0_i32_1 = arith.constant 0 : i32
    return %c0_i32, %c0_i32_0 : i32, i32
  }
  func.func @transform_8(%arg0: i32, %arg1: i32) -> (i32, i32) {
    %c0_i32 = arith.constant 0 : i32
    %c0_i32_0 = arith.constant 0 : i32
    %c0_i32_1 = arith.constant 0 : i32
    return %c0_i32, %c0_i32_0 : i32, i32
  }
  func.func @transform_9(%arg0: i32, %arg1: i32) -> (i32, i32) {
    %c0_i32 = arith.constant 0 : i32
    %c0_i32_0 = arith.constant 0 : i32
    %c0_i32_1 = arith.constant 0 : i32
    return %c0_i32, %c0_i32_0 : i32, i32
  }
}

</mosaic_0001>

<bundles_post_ra>
// kernel: tpu_custom_call.1
= control target key start
LH: loop header
LB: loop body
LE: loop exit
PB: predicated region body
PF: predicated region fallthrough
CT: control target
= control target key end

     0   :  { %14 = vsyncpa [#allocation9], 0  ;;  %s1470_s30 = smov 0   ;;  %s1472_s10 = smov 0   ;;  %s1763_s0 = inlined_call_operand.vmem [shape: f32[2,16,4], index: 0, kind: input, shape index: {}]   ;;  %s1764_s1 = inlined_call_operand.vmem [shape: f32[4,64], index: 1, kind: input, shape index: {}]   ;;  %s1765_s2 = inlined_call_operand.vmem [shape: f32[64,256], index: 2, kind: input, shape index: {}]   ;;  %s1766_s3 = inlined_call_operand.vmem [shape: f32[1,64], index: 3, kind: input, shape index: {}]   ;;  %s1767_s4 = inlined_call_operand.vmem [shape: f32[1,64], index: 4, kind: input, shape index: {}]   ;;  %s1768_s5 = inlined_call_operand.vmem [shape: f32[1,256], index: 5, kind: input, shape index: {}]   ;;  %s1769_s6 = inlined_call_operand.vmem [shape: f32[1,256], index: 6, kind: input, shape index: {}]   ;;  %s1770_s7 = inlined_call_operand.vmem [shape: f32[256,16], index: 7, kind: input, shape index: {}]   ;;  %s1771_s8 = inlined_call_operand.vmem [shape: f32[1,16], index: 8, kind: input, shape index: {}]   ;;  %s1772_s9 = inlined_call_operand.hbm [shape: f32[2,16], index: 9, kind: output, shape index: {}]  }
   0x1   :  { %s1474_s11 = smov 0  }
   0x2 LB: > { %s1228_s12 = sadd.s32 4294967295, %s1410_s11   ;;  %s32_s13 = sadd.s32 1, %s1406_s10  ;;  %s1410_s11 = sphi %s1474_s11, %s20_s11   ;;  %s1406_s10 = sphi %s1472_s10, %s1777_s10   ;;  %s1402_s30 = sphi %s1470_s30, %s1776_s30  }
   0x3   : > { %p34_p0 = scmp.ge.s32.totalorder %s32_s13, 2  ;;  %p1231_p1 = scmp.ge.s32.totalorder %s1410_s11, 1 }
   0x4   : > { %p296_p2 = scmp.lt.s32.totalorder %s1410_s11, 3 }
   0x5   : > { %s1779_s13 = smov (%p34_p0, %s32_s13), 0 }
   0x6   : > { %p297_p3 = pnand %p1231_p1, %p296_p2 }
   0x7   : > { %p1232_p4 = scmp.ne.s32.totalorder (!%p297_p3), %s1402_s30, 0 }
   0x8   : > { %300 = sbr.rel (%p297_p3) target bundleno = 942 (0x3ae), region = 56 }
   0xd   : > { %v1494_v0 = vld [vmem:[%s1763_s0] sm:$0xff]  ;;  %v1499_v1 = vld [vmem:[%s1763_s0 + $0x8] sm:$0xff]  ;;  %v1504_v2 = vld [vmem:[%s1763_s0 + $0x10] sm:$0xff]  ;;  %340 = sbr.rel (%p1232_p4) target bundleno = 241 (0xf1), region = 60 }
   0xe   : > { %v1509_v3 = vld [vmem:[%s1763_s0 + $0x18] sm:$0xff] }
  0x12   : > { %v348_v4 = vld [vmem:[%s1764_s1] sm:$0xf]  ;;  %vm362_vm0 = vcmask 1043456   ;;  %vm349_vm1 = vcmask 31744   ;;  %vm345_vm2 = vcmask 516096   ;;  %v1412_v5 = vmov 0.0  }
  0x13   : > { %1300 = vmatprep.subr.msk.mxu0 %vm362_vm0, %v348_v4  ;;  %1316 = vmatprep.subr.msk.mxu1 %vm362_vm0, %v348_v4  ;;  %346 = vst.msk [vmem:[#allocation2] sm:$0x1] %vm345_vm2, %v1412_v5  ;;  %347 = vst.msk [vmem:[#allocation3] sm:$0x1] %vm345_vm2, %v1412_v5  ;;  %vm452_vm3 = vcmask 523264  }
  0x14   : > { %1301 = vmatpush3.msk.msra.mxu0 %vm362_vm0, %v348_v4  ;;  %1317 = vmatpush3.msk.msra.mxu1 %vm362_vm0, %v348_v4 }
  0x15   : > { %1302 = vmatprep.mubr.msk.f32.mxu0 %vm349_vm1, %v1494_v0  ;;  %1305 = vmatprep.mubr.msk.f32.mxu1 %vm349_vm1, %v1504_v2 }
  0x16   : > { %1303 = vmatmul.mubr.msk.f32.vlgmr.msra.gmra.mxu0 %vm349_vm1, %v1499_v1  ;;  %1306 = vmatmul.mubr.msk.f32.vlgmr.msra.gmra.mxu1 %vm349_vm1, %v1509_v3 }
  0x1a   : > { %v451_v37 = vld [vmem:[#allocation2] sm:$0x1]  ;;  %v469_v40 = vld [vmem:[#allocation3] sm:$0x1] }
  0xd6   : > { %v1304_v6 = vpop.f32.mrf.mxu0  ;;  %v1307_v7 = vpop.f32.mrf.mxu1 }
  0xd7   : > { %v471_v8 = vmul.f32 %v1304_v6, %v1304_v6  ;;  %v454_v11 = vsel %vm452_vm3, %v1304_v6, 0.0  ;;  %v473_v17 = vmul.f32 %v1307_v7, %v1307_v7  ;;  %v458_v22 = vsel %vm452_vm3, %v1307_v7, 0.0 }
  0xd8   : > { %v432_v9 = vpop.f32.mrf.mxu0  ;;  %v442_v10 = vpop.f32.mrf.mxu1 }
  0xd9   : > { %v453_v12 = vsel %vm452_vm3, %v432_v9, 0.0  ;;  %v470_v13 = vmul.f32 %v432_v9, %v432_v9  ;;  %v472_v15 = vmul.f32 %v442_v10, %v442_v10  ;;  %v475_v16 = vsel %vm452_vm3, %v471_v8, 0.0 }
  0xda   : > { %v455_v14 = vadd.f32 %v454_v11, %v453_v12  ;;  %v456_v19 = vsel %vm452_vm3, %v442_v10, 0.0  ;;  %v479_v26 = vsel %vm452_vm3, %v473_v17, 0.0 }
  0xdb   : > { %v474_v18 = vsel %vm452_vm3, %v470_v13, 0.0  ;;  %v477_v23 = vsel %vm452_vm3, %v472_v15, 0.0 }
  0xdc   : > { %v476_v20 = vadd.f32 %v475_v16, %v474_v18  ;;  %v457_v21 = vadd.f32 %v456_v19, %v455_v14 }
  0xde   : > { %v459_v24 = vadd.f32 %v458_v22, %v457_v21  ;;  %v478_v25 = vadd.f32 %v477_v23, %v476_v20 }
  0xe0   : > { %v460_v27 = vrot.slane %v459_v24, 4  ;;  %v480_v28 = vadd.f32 %v479_v26, %v478_v25 }
  0xe2   : > { %v461_v29 = vadd.f32 %v460_v27, %v459_v24  ;;  %v481_v30 = vrot.slane %v480_v28, 4 }
  0xe4   : > { %v462_v31 = vrot.slane %v461_v29, 2  ;;  %v482_v32 = vadd.f32 %v481_v30, %v480_v28 }
  0xe6   : > { %v463_v33 = vadd.f32 %v462_v31, %v461_v29  ;;  %v483_v34 = vrot.slane %v482_v32, 2 }
  0xe8   : > { %v464_v35 = vrot.slane %v463_v33, 1  ;;  %v484_v36 = vadd.f32 %v483_v34, %v482_v32 }
  0xea   : > { %v465_v38 = vadd.f32 %v464_v35, %v463_v33  ;;  %v485_v39 = vrot.slane %v484_v36, 1 }
  0xec   : > { %v466_v41 = vadd.f32 %v465_v38, %v451_v37  ;;  %v486_v42 = vadd.f32 %v485_v39, %v484_v36 }
  0xee   : > { %468 = vst.msk [vmem:[#allocation2] sm:$0x1] %vm345_vm2, %v466_v41  ;;  %v487_v43 = vadd.f32 %v486_v42, %v469_v40 }
  0xf0   : > { %488 = vst.msk [vmem:[#allocation3] sm:$0x1] %vm345_vm2, %v487_v43 }
  0xf1 PF: > { %p1238_p5 = scmp.ne.s32.totalorder %s1402_s30, 1 }
  0xf3   : > { %492 = sbr.rel (%p1238_p5) target bundleno = 927 (0x39f), region = 68 }
  0xf8   : > { %v518_v44 = vld [vmem:[%s1764_s1] sm:$0xf]  ;;  %vm532_vm4 = vcmask 1043456   ;;  %vm519_vm5 = vcmask 31744   ;;  %v660_v45 = vld [vmem:[%s1765_s2 + $0x78] sm:$0xff]  ;;  %v659_v46 = vld [vmem:[%s1765_s2 + $0x70] sm:$0xff]  ;;  %v497_v62 = vlaneseq }
  0xf9   : > { %1308 = vmatprep.subr.msk.mxu1 %vm532_vm4, %v518_v44  ;;  %1310 = vmatprep.mubr.msk.f32.mxu1 %vm519_vm5, %v1494_v0  ;;  %v658_v47 = vld [vmem:[%s1765_s2 + $0x68] sm:$0xff]  ;;  %v657_v48 = vld [vmem:[%s1765_s2 + $0x60] sm:$0xff]  ;;  %v656_v49 = vld [vmem:[%s1765_s2 + $0x58] sm:$0xff]  ;;  %v1413_v61 = vmov 0.0   ;;  %vm661_vm7 = vcmask 523264   ;;  %v1414_v33 = vmov -inf  }
  0xfa   : > { %1309 = vmatpush3.msk.msra.mxu1 %vm532_vm4, %v518_v44  ;;  %v655_v50 = vld [vmem:[%s1765_s2 + $0x50] sm:$0xff]  ;;  %v654_v51 = vld [vmem:[%s1765_s2 + $0x48] sm:$0xff]  ;;  %v653_v52 = vld [vmem:[%s1765_s2 + $0x40] sm:$0xff]  ;;  %vm1591_vm6 = vcmp.lt.s32.totalorder %v497_v62, 256  ;;  %v1602_v10 = vshrl.u32 %v497_v62, 7  ;;  %v1415_v34 = vmov inf  }
  0xfb   : > { %1311 = vmatmul.mubr.msk.f32.vlgmr.msra.gmra.mxu1 %vm519_vm5, %v1499_v1  ;;  %690 = vmatprep.subr.mxu1 %v660_v45  ;;  %v652_v53 = vld [vmem:[%s1765_s2 + $0x38] sm:$0xff]  ;;  %v651_v54 = vld [vmem:[%s1765_s2 + $0x30] sm:$0xff]  ;;  %v650_v55 = vld [vmem:[%s1765_s2 + $0x28] sm:$0xff]  ;;  %501 = vst.msk [vmem:[#allocation4] sm:$0x3] %vm1591_vm6, %v1413_v61  ;;  %vm907_vm8 = vcmask 1041409  }
  0xfc   : > { %1313 = vmatprep.mubr.msk.f32.mxu1 %vm519_vm5, %v1504_v2  ;;  %691 = vmatpush1.msra.mxu1 %v659_v46  ;;  %v649_v56 = vld [vmem:[%s1765_s2 + $0x20] sm:$0xff]  ;;  %v648_v57 = vld [vmem:[%s1765_s2 + $0x18] sm:$0xff]  ;;  %v647_v58 = vld [vmem:[%s1765_s2 + $0x10] sm:$0xff]  ;;  %502 = vst.msk [vmem:[#allocation5] sm:$0x3] %vm1591_vm6, %v1413_v61  ;;  %v1605_v12 = vsub.s32 0, %v1602_v10 }
  0xfd   : > { %692 = vmatprep.subr.mxu1 %v658_v47  ;;  %v646_v59 = vld [vmem:[%s1765_s2 + $0x8] sm:$0xff]  ;;  %v645_v60 = vld [vmem:[%s1765_s2] sm:$0xff]  ;;  %503 = vst [vmem:[#allocation6] sm:$0xf] %v1414_v33  ;;  %504 = vst [vmem:[#allocation7] sm:$0xf] %v1415_v34 }
  0xfe   : > { %693 = vmatpush1.msra.mxu1 %v657_v48  ;;  %v505_v0 = vld [vmem:[#allocation2] sm:$0x1]  ;;  %v507_v2 = vld [vmem:[#allocation3] sm:$0x1]  ;;  %v1090_v35 = vld [vmem:[%s1770_s7 + $0xf8] sm:$0xff]  ;;  %vm909_vm9 = vcmask 1043459  }
  0xff   : > { %1314 = vmatmul.mubr.msk.f32.gmra.mxu1 %vm519_vm5, %v1509_v3  ;;  %694 = vmatprep.subr.mxu1 %v656_v49  ;;  %v506_v1 = vmul.f32 0.03125, %v505_v0  ;;  %v508_v3 = vmul.f32 0.03125, %v507_v2  ;;  %v511_v8 = vld [vmem:[%s1766_s3] sm:$0x1]  ;;  %v1074_v36 = vld [vmem:[%s1770_s7 + $0x78] sm:$0xff]  ;;  %v1089_v37 = vld [vmem:[%s1770_s7 + $0xf0] sm:$0xff] }
 0x100   : > { %695 = vmatpush1.msra.mxu1 %v655_v50  ;;  %738 = vmatprep.mubr.f32.mxu1 %v1413_v61  ;;  %v515_v13 = vld [vmem:[%s1767_s4] sm:$0x1]  ;;  %v1073_v38 = vld [vmem:[%s1770_s7 + $0x70] sm:$0xff]  ;;  %v1088_v39 = vld [vmem:[%s1770_s7 + $0xe8] sm:$0xff]  ;;  %vm911_vm10 = vcmask 1045509   ;;  %vm913_vm11 = vcmask 1047559  }
 0x101   : > { %696 = vmatprep.subr.mxu1 %v654_v51  ;;  %v509_v4 = vmul.f32 %v506_v1, %v506_v1  ;;  %1265 = vmatprep.subr.mxu0 %v1090_v35  ;;  %v1072_v40 = vld [vmem:[%s1770_s7 + $0x68] sm:$0xff]  ;;  %v1087_v41 = vld [vmem:[%s1770_s7 + $0xe0] sm:$0xff]  ;;  %v1086_v43 = vld [vmem:[%s1770_s7 + $0xd8] sm:$0xff]  ;;  %vm1168_vm15 = vcmask 123904  }
 0x102   : > { %697 = vmatpush1.msra.mxu1 %v653_v52  ;;  %1266 = vmatpush3.msra.mxu0 %v1074_v36  ;;  %v1071_v42 = vld [vmem:[%s1770_s7 + $0x60] sm:$0xff]  ;;  %v1070_v44 = vld [vmem:[%s1770_s7 + $0x58] sm:$0xff]  ;;  %v1085_v45 = vld [vmem:[%s1770_s7 + $0xd0] sm:$0xff] }
 0x103   : > { %698 = vmatprep.subr.mxu1 %v652_v53  ;;  %v510_v5 = vsub.f32 %v508_v3, %v509_v4  ;;  %1267 = vmatprep.subr.mxu0 %v1089_v37  ;;  %v1069_v46 = vld [vmem:[%s1770_s7 + $0x50] sm:$0xff]  ;;  %v1084_v47 = vld [vmem:[%s1770_s7 + $0xc8] sm:$0xff]  ;;  %v1083_v49 = vld [vmem:[%s1770_s7 + $0xc0] sm:$0xff] }
 0x104   : > { %699 = vmatpush1.msra.mxu1 %v651_v54  ;;  %1268 = vmatpush3.msra.mxu0 %v1073_v38  ;;  %v1068_v48 = vld [vmem:[%s1770_s7 + $0x48] sm:$0xff]  ;;  %v1067_v50 = vld [vmem:[%s1770_s7 + $0x40] sm:$0xff]  ;;  %v1082_v51 = vld [vmem:[%s1770_s7 + $0xb8] sm:$0xff] }
 0x105   : > { %700 = vmatprep.subr.mxu1 %v650_v55  ;;  %v512_v6 = vadd.f32 1e-05, %v510_v5  ;;  %1269 = vmatprep.subr.mxu0 %v1088_v39  ;;  %v1066_v52 = vld [vmem:[%s1770_s7 + $0x38] sm:$0xff]  ;;  %v1081_v53 = vld [vmem:[%s1770_s7 + $0xb0] sm:$0xff]  ;;  %v1080_v55 = vld [vmem:[%s1770_s7 + $0xa8] sm:$0xff] }
 0x106   : > { %701 = vmatpush1.msra.mxu1 %v649_v56  ;;  %1270 = vmatpush3.msra.mxu0 %v1072_v40  ;;  %v1065_v54 = vld [vmem:[%s1770_s7 + $0x30] sm:$0xff]  ;;  %v1064_v56 = vld [vmem:[%s1770_s7 + $0x28] sm:$0xff]  ;;  %v1075_v2 = vld [vmem:[%s1770_s7 + $0x80] sm:$0xff] }
 0x107   : > { %702 = vmatprep.subr.mxu1 %v648_v57  ;;  %1356 = vrsqrt.f32 %v512_v6  ;;  %1271 = vmatprep.subr.mxu0 %v1087_v41  ;;  %v1079_v57 = vld [vmem:[%s1770_s7 + $0xa0] sm:$0xff]  ;;  %v1061_v62 = vld [vmem:[%s1770_s7 + $0x10] sm:$0xff]  ;;  %v1076_v0 = vld [vmem:[%s1770_s7 + $0x88] sm:$0xff] }
 0x108   : > { %703 = vmatpush1.msra.mxu1 %v647_v58  ;;  %1272 = vmatpush3.msra.mxu0 %v1071_v42  ;;  %v1063_v58 = vld [vmem:[%s1770_s7 + $0x20] sm:$0xff] }
 0x109   : > { %704 = vmatprep.subr.mxu1 %v646_v59  ;;  %1273 = vmatprep.subr.mxu0 %v1086_v43  ;;  %v1078_v59 = vld [vmem:[%s1770_s7 + $0x98] sm:$0xff]  ;;  %v1059_v3 = vld [vmem:[%s1770_s7] sm:$0xff] }
 0x10a   : > { %705 = vmatpush1.msra.mxu1 %v645_v60  ;;  %1274 = vmatpush3.msra.mxu0 %v1070_v44  ;;  %v1062_v60 = vld [vmem:[%s1770_s7 + $0x18] sm:$0xff] }
 0x10b   : > { %1275 = vmatprep.subr.mxu0 %v1085_v45 }
 0x10c   : > { %1276 = vmatpush3.msra.mxu0 %v1069_v46 }
 0x10d   : > { %1277 = vmatprep.subr.mxu0 %v1084_v47 }
 0x10e   : > { %1278 = vmatpush3.msra.mxu0 %v1068_v48 }
 0x10f   : > { %1279 = vmatprep.subr.mxu0 %v1083_v49 }
 0x110   : > { %1280 = vmatpush3.msra.mxu0 %v1067_v50 }
 0x111   : > { %1281 = vmatprep.subr.mxu0 %v1082_v51 }
 0x112   : > { %1282 = vmatpush3.msra.mxu0 %v1066_v52 }
 0x113   : > { %1283 = vmatprep.subr.mxu0 %v1081_v53 }
 0x114   : > { %v1357_v7 = vpop.eup %1356  ;;  %1284 = vmatpush3.msra.mxu0 %v1065_v54 }
 0x115   : > { %v514_v9 = vmul.f32 %v1357_v7, %v511_v8  ;;  %1285 = vmatprep.subr.mxu0 %v1080_v55 }
 0x116   : > { %1286 = vmatpush3.msra.mxu0 %v1064_v56 }
 0x117   : > { %v516_v11 = vmul.f32 %v514_v9, %v506_v1  ;;  %v625_v15 = vrot.slane %v514_v9, %v1605_v12  ;;  %1287 = vmatprep.subr.mxu0 %v1079_v57  ;;  %v1060_v1 = vld [vmem:[%s1770_s7 + $0x8] sm:$0xff] }
 0x118   : > { %1288 = vmatpush3.msra.mxu0 %v1063_v58 }
 0x119   : > { %v517_v14 = vsub.f32 %v515_v13, %v516_v11  ;;  %1289 = vmatprep.subr.mxu0 %v1078_v59 }
 0x11a   : > { %1290 = vmatpush3.msra.mxu0 %v1062_v60 }
 0x11b   : > { %v635_v19 = vrot.slane %v517_v14, %v1605_v12 }
 0x1bb   : > { %v1312_v16 = vpop.f32.mrf.mxu1 }
 0x1bc   : > { %v628_v18 = vmul.f32 %v1312_v16, %v625_v15 }
 0x1bd   : > { %v602_v17 = vpop.f32.mrf.mxu1 }
 0x1be   : > { %v627_v20 = vmul.f32 %v625_v15, %v602_v17  ;;  %v638_v24 = vadd.f32 %v635_v19, %v628_v18 }
 0x1bf   : > { %v1315_v21 = vpop.f32.mrf.mxu1 }
 0x1c0   : > { %v637_v22 = vadd.f32 %v635_v19, %v627_v20  ;;  %v642_v27 = vmax.f32 %v638_v24, 0.0  ;;  %v630_v28 = vmul.f32 %v1315_v21, %v625_v15 }
 0x1c1   : > { %v612_v23 = vpop.f32.mrf.mxu1 }
 0x1c2   : > { %v641_v25 = vmax.f32 %v637_v22, 0.0  ;;  %v629_v26 = vmul.f32 %v625_v15, %v612_v23  ;;  %v640_v30 = vadd.f32 %v635_v19, %v630_v28 }
 0x1c4   : > { %1244 = vmatmul.mubr.msk.f32.vlgmr.msra.gmra.mxu1 %vm661_vm7, %v641_v25  ;;  %v639_v29 = vadd.f32 %v635_v19, %v629_v26  ;;  %v644_v32 = vmax.f32 %v640_v30, 0.0 }
 0x1c5   : > { %744 = vmatprep.mubr.f32.mxu1 %v1413_v61 }
 0x1c6   : > { %v643_v31 = vmax.f32 %v639_v29, 0.0  ;;  %v1416_v29 = vmov 1966171168  }
 0x1c7   : > { %v786_v30 = vunpack.c.l.s4 %v1416_v29 }
 0x1c8   : > { %1245 = vmatmul.mubr.msk.f32.gmra.mxu1 %vm661_vm7, %v642_v27 }
 0x1c9   : > { %750 = vmatprep.mubr.f32.mxu1 %v1413_v61  ;;  %v787_v53 = vunpack.c.0.s8 %v786_v30 }
 0x1cc   : > { %1246 = vmatmul.mubr.msk.f32.gmra.mxu1 %vm661_vm7, %v643_v31 }
 0x1cd   : > { %756 = vmatprep.mubr.f32.mxu1 %v1413_v61  ;;  %v1077_v61 = vld [vmem:[%s1770_s7 + $0x90] sm:$0xff] }
 0x1ce   : > { %1291 = vmatprep.subr.mxu0 %v1077_v61 }
 0x1cf   : > { %1292 = vmatpush3.msra.mxu0 %v1061_v62 }
 0x1d0   : > { %1247 = vmatmul.mubr.msk.f32.gmra.mxu1 %vm661_vm7, %v644_v32  ;;  %1293 = vmatprep.subr.mxu0 %v1076_v0 }
 0x1d1   : > { %1294 = vmatpush3.msra.mxu0 %v1060_v1 }
 0x1d2   : > { %1295 = vmatprep.subr.mxu0 %v1075_v2  ;;  %v1417_v2 = vmov 1983009808  }
 0x1d3   : > { %1296 = vmatpush3.msra.mxu0 %v1059_v3  ;;  %v888_v3 = vunpack.c.l.s4 %v1417_v2 }
 0x284   : > { %v740_v4 = vpop.f32.mrf.mxu1 }
 0x285   : > { %v807_v11 = vmul.f32 %v740_v4, %v740_v4 }
 0x286   : > { %v742_v5 = vpop.f32.mrf.mxu1 }
 0x287   : > { %v808_v31 = vmul.f32 %v742_v5, %v742_v5 }
 0x288   : > { %v746_v6 = vpop.f32.mrf.mxu1 }
 0x289   : > { %v809_v8 = vmul.f32 %v746_v6, %v746_v6  ;;  %v764_v13 = vadd.f32 %v746_v6, %v740_v4  ;;  %v854_v18 = vmax.f32 %v740_v4, %v746_v6  ;;  %v919_v19 = vmin.f32 %v740_v4, %v746_v6 }
 0x28a   : > { %v748_v7 = vpop.f32.mrf.mxu1 }
 0x28b   : > { %v815_v16 = vadd.f32 %v809_v8, %v807_v11  ;;  %v861_v20 = vmax.f32 %v742_v5, %v748_v7  ;;  %v926_v21 = vmin.f32 %v742_v5, %v748_v7  ;;  %v810_v26 = vmul.f32 %v748_v7, %v748_v7 }
 0x28c   : > { %v752_v9 = vpop.f32.mrf.mxu1  ;;  %v773_v32 = vadd.f32 %v748_v7, %v742_v5  ;;  %v855_v35 = vrot.slane %v854_v18, 4  ;;  %v920_v36 = vrot.slane %v919_v19, 4  ;;  %v1713_v5 = vsub.s32 %v787_v53, %v1602_v10 }
 0x28d   : > { %v811_v14 = vmul.f32 %v752_v9, %v752_v9  ;;  %v765_v17 = vadd.f32 %v764_v13, %v752_v9  ;;  %v862_v37 = vrot.slane %v861_v20, 4  ;;  %v927_v38 = vrot.slane %v926_v21, 4 }
 0x28e   : > { %v754_v15 = vpop.f32.mrf.mxu1  ;;  %v824_v44 = vadd.f32 %v810_v26, %v808_v31  ;;  %v856_v54 = vmax.f32 %v854_v18, %v855_v35  ;;  %v921_v55 = vmin.f32 %v919_v19, %v920_v36 }
 0x28f   : > { %v816_v23 = vadd.f32 %v815_v16, %v811_v14  ;;  %v812_v40 = vmul.f32 %v754_v15, %v754_v15  ;;  %v774_v43 = vadd.f32 %v773_v32, %v754_v15  ;;  %v863_v51 = vmax.f32 %v861_v20, %v862_v37 }
 0x290   : > { %v758_v22 = vpop.f32.mrf.mxu1  ;;  %v928_v52 = vmin.f32 %v926_v21, %v927_v38  ;;  %v857_v6 = vrot.slane %v856_v54, 2  ;;  %v922_v7 = vrot.slane %v921_v55, 2 }
 0x291   : > { %v766_v24 = vadd.f32 %v765_v17, %v758_v22  ;;  %v813_v25 = vmul.f32 %v758_v22, %v758_v22  ;;  %v868_v27 = vmax.f32 %v752_v9, %v758_v22  ;;  %v933_v28 = vmin.f32 %v752_v9, %v758_v22 }
 0x292   : > { %v760_v39 = vpop.f32.mrf.mxu1  ;;  %v825_v57 = vadd.f32 %v824_v44, %v812_v40  ;;  %v864_v1 = vrot.slane %v863_v51, 2  ;;  %v929_v4 = vrot.slane %v928_v52, 2  ;;  %v923_v26 = vmin.f32 %v921_v55, %v922_v7 }
 0x293   : > { %v767_v33 = vrot.slane %v766_v24, 4  ;;  %v817_v34 = vadd.f32 %v816_v23, %v813_v25  ;;  %v869_v45 = vrot.slane %v868_v27, 4  ;;  %v934_v46 = vrot.slane %v933_v28, 4 }
 0x294   : > { %v775_v49 = vadd.f32 %v774_v43, %v760_v39  ;;  %v814_v50 = vmul.f32 %v760_v39, %v760_v39  ;;  %v875_v14 = vmax.f32 %v754_v15, %v760_v39  ;;  %v940_v16 = vmin.f32 %v754_v15, %v760_v39 }
 0x295   : > { %v768_v41 = vadd.f32 %v767_v33, %v766_v24  ;;  %v818_v42 = vrot.slane %v817_v34, 4  ;;  %v870_v58 = vmax.f32 %v868_v27, %v869_v45  ;;  %v935_v59 = vmin.f32 %v933_v28, %v934_v46 }
 0x296   : > { %v776_v56 = vrot.slane %v775_v49, 4  ;;  %v826_v0 = vadd.f32 %v825_v57, %v814_v50  ;;  %v865_v21 = vmax.f32 %v863_v51, %v864_v1  ;;  %v930_v22 = vmin.f32 %v928_v52, %v929_v4 }
 0x297   : > { %v769_v47 = vrot.slane %v768_v41, 2  ;;  %v819_v48 = vadd.f32 %v818_v42, %v817_v34  ;;  %v871_v11 = vrot.slane %v870_v58, 2  ;;  %v936_v13 = vrot.slane %v935_v59, 2 }
 0x298   : > { %v777_v62 = vadd.f32 %v776_v56, %v775_v49  ;;  %v827_v9 = vrot.slane %v826_v0, 4  ;;  %v876_v23 = vrot.slane %v875_v14, 4  ;;  %v941_v24 = vrot.slane %v940_v16, 4 }
 0x299   : > { %v770_v60 = vadd.f32 %v769_v47, %v768_v41  ;;  %v820_v61 = vrot.slane %v819_v48, 2  ;;  %v858_v25 = vmax.f32 %v856_v54, %v857_v6  ;;  %v872_v29 = vmax.f32 %v870_v58, %v871_v11  ;;  %v763_v54 = vld [vmem:[#allocation4] sm:$0x3] }
 0x29a   : > { %v778_v8 = vrot.slane %v777_v62, 2  ;;  %v828_v20 = vadd.f32 %v827_v9, %v826_v0  ;;  %v937_v30 = vmin.f32 %v935_v59, %v936_v13  ;;  %v877_v31 = vmax.f32 %v875_v14, %v876_v23 }
 0x29b   : > { %v771_v17 = vrot.slane %v770_v60, 1  ;;  %v821_v18 = vadd.f32 %v820_v61, %v819_v48  ;;  %v942_v32 = vmin.f32 %v940_v16, %v941_v24  ;;  %v866_v36 = vrot.slane %v865_v21, 1  ;;  %v853_v24 = vld [vmem:[#allocation6] sm:$0xf] }
 0x29c   : > { %v779_v19 = vadd.f32 %v778_v8, %v777_v62  ;;  %v829_v28 = vrot.slane %v828_v20, 2  ;;  %v931_v37 = vrot.slane %v930_v22, 1  ;;  %v878_v38 = vrot.slane %v877_v31, 2  ;;  %v806_v8 = vld [vmem:[#allocation5] sm:$0x3] }
 0x29d   : > { %v772_v33 = vadd.f32 %v771_v17, %v770_v60  ;;  %v822_v34 = vrot.slane %v821_v18, 1  ;;  %v943_v39 = vrot.slane %v942_v32, 2  ;;  %v859_v40 = vrot.slane %v858_v25, 1 }
 0x29e   : > { %v780_v27 = vrot.slane %v779_v19, 1  ;;  %v830_v15 = vadd.f32 %v829_v28, %v828_v20  ;;  %v924_v41 = vrot.slane %v923_v26, 1  ;;  %v873_v44 = vrot.slane %v872_v29, 1 }
 0x29f   : > { %v938_v45 = vrot.slane %v937_v30, 1  ;;  %v879_v46 = vmax.f32 %v877_v31, %v878_v38  ;;  %v944_v47 = vmin.f32 %v942_v32, %v943_v39  ;;  %v889_v48 = vunpack.c.0.s8 %v888_v3  ;;  %v986_v38 = vld [vmem:[%s1768_s5] sm:$0x3] }
 0x2a0   : > { %v781_v35 = vadd.f32 %v780_v27, %v779_v19  ;;  %v831_v43 = vrot.slane %v830_v15, 1  ;;  %v823_v49 = vadd.f32 %v822_v34, %v821_v18  ;;  %v867_v52 = vmax.f32 %v865_v21, %v866_v36 }
 0x2a1   : > { %v932_v53 = vmin.f32 %v930_v22, %v931_v37  ;;  %v880_v55 = vrot.slane %v879_v46, 1  ;;  %v945_v56 = vrot.slane %v944_v47, 1  ;;  %v860_v57 = vmax.f32 %v858_v25, %v859_v40 }
 0x2a2   : > { %v784_v42 = vcombine.low %v772_v33, %v781_v35  ;;  %v832_v51 = vadd.f32 %v831_v43, %v830_v15  ;;  %v925_v58 = vmin.f32 %v923_v26, %v924_v41  ;;  %v874_v61 = vmax.f32 %v872_v29, %v873_v44  ;;  %v918_v26 = vld [vmem:[#allocation7] sm:$0xf]  ;;  %v990_v41 = vld [vmem:[%s1769_s6] sm:$0x3] }
 0x2a3   : > { %v939_v62 = vmin.f32 %v937_v30, %v938_v45  ;;  %v881_v0 = vmax.f32 %v879_v46, %v880_v55  ;;  %v946_v1 = vmin.f32 %v944_v47, %v945_v56  ;;  %v892_v2 = vsub.s32 %v889_v48, %v1602_v10 }
 0x2a4   : > { %v791_v50 = vrot.slane %v784_v42, %v1713_v5  ;;  %v835_v60 = vcombine.low %v823_v49, %v832_v51  ;;  %v886_v6 = vcombine.low %v860_v57, %v867_v52  ;;  %v951_v7 = vcombine.low %v925_v58, %v932_v53 }
 0x2a5   : > { %v894_v9 = vcombine.low %v874_v61, %v881_v0  ;;  %v959_v11 = vcombine.low %v939_v62, %v946_v1  ;;  %v1003_v45 = vsub.s32 1, %v1602_v10  ;;  %v1418_v46 = vmov 0  }
 0x2a6   : > { %v798_v59 = vrot.slane %v791_v50, %v1713_v5  ;;  %v842_v4 = vrot.slane %v835_v60, %v1713_v5  ;;  %v893_v18 = vrot.slane %v886_v6, %v892_v2  ;;  %v958_v19 = vrot.slane %v951_v7, %v892_v2 }
 0x2a7   : > { %v901_v14 = vrot.slane %v894_v9, %v892_v2  ;;  %v966_v16 = vrot.slane %v959_v11, %v892_v2  ;;  %v1250_v2 = vld [vmem:[%s1771_s8] ss:$0 sm:$0xff] }
 0x2a8   : > { %v800_v3 = vadd.f32 %v798_v59, %v763_v54  ;;  %v849_v13 = vrot.slane %v842_v4, %v1713_v5 }
 0x2a9   : > { %v906_v20 = vrot.slane %v901_v14, 7  ;;  %v969_v21 = vrot.slane %v966_v16, 7 }
 0x2aa   : > { %805 = vst.msk [vmem:[#allocation4] sm:$0x3] %vm1591_vm6, %v800_v3  ;;  %v851_v17 = vadd.f32 %v849_v13, %v806_v8 }
 0x2ab   : > { %v908_v22 = vsel %vm907_vm8, %v906_v20, %v893_v18  ;;  %v970_v23 = vsel %vm907_vm8, %v969_v21, %v958_v19 }
 0x2ac   : > { %852 = vst.msk [vmem:[#allocation5] sm:$0x3] %vm1591_vm6, %v851_v17  ;;  %v910_v25 = vsel %vm909_vm9, %v906_v20, %v908_v22  ;;  %v971_v5 = vsel %vm909_vm9, %v969_v21, %v970_v23 }
 0x2ad   : > { %v912_v27 = vsel %vm911_vm10, %v906_v20, %v910_v25  ;;  %v972_v28 = vsel %vm911_vm10, %v969_v21, %v971_v5 }
 0x2ae   : > { %v914_v30 = vsel %vm913_vm11, %v906_v20, %v912_v27  ;;  %v973_v31 = vsel %vm913_vm11, %v969_v21, %v972_v28 }
 0x2af   : > { %v916_v33 = vmax.f32 %v853_v24, %v914_v30  ;;  %v975_v34 = vmin.f32 %v918_v26, %v973_v31 }
 0x2b1   : > { %v980_v29 = vld [vmem:[#allocation4] sm:$0x3]  ;;  %917 = vst [vmem:[#allocation6] sm:$0xf] %v916_v33  ;;  %976 = vst [vmem:[#allocation7] sm:$0xf] %v975_v34 }
 0x2b2   : > { %v981_v32 = vmul.f32 0.03125, %v980_v29 }
 0x2b3   : > { %v982_v63 = vld [vmem:[#allocation5] sm:$0x3] }
 0x2b4   : > { %v984_v35 = vmul.f32 %v981_v32, %v981_v32  ;;  %v983_v15 = vmul.f32 0.03125, %v982_v63 }
 0x2b6   : > { %v985_v36 = vsub.f32 %v983_v15, %v984_v35 }
 0x2b8   : > { %v987_v37 = vadd.f32 1e-05, %v985_v36  ;;  %v1248_v42 = vld.sshfl [vmem:[#allocation6] sm:$0x33 pattern:$0x76325410] }
 0x2b9   : > { %v1249_v44 = vld.sshfl [vmem:[#allocation7] sm:$0x33 pattern:$0x76325410]  ;;  %v1015_v51 = vcombine.high %v1248_v42, %v1248_v42 }
 0x2ba   : > { %1358 = vrsqrt.f32 %v987_v37  ;;  %v1026_v52 = vcombine.high %v1249_v44, %v1249_v44 }
 0x2c7   : > { %v1359_v39 = vpop.eup %1358 }
 0x2c8   : > { %v989_v40 = vmul.f32 %v1359_v39, %v986_v38 }
 0x2ca   : > { %v991_v43 = vmul.f32 %v989_v40, %v981_v32  ;;  %vm993_vm12 = vcmp.gt.f32.partialorder %v989_v40, 0.0  ;;  %v1039_v53 = vrot.slane %v989_v40, %v1003_v45  ;;  %v1035_v54 = vrot.slane %v989_v40, %v1605_v12 }
 0x2cb   : > { %v996_v47 = vsel %vm993_vm12, 1, %v1418_v46 }
 0x2cc   : > { %v992_v48 = vsub.f32 %v990_v41, %v991_v43  ;;  %v1000_v49 = vrot.slane %v996_v47, %v1605_v12  ;;  %v1004_v50 = vrot.slane %v996_v47, %v1003_v45 }
 0x2ce   : > { %vm1005_vm13 = vcmp.eq.s32.totalorder %v1000_v49, 1  ;;  %vm1006_vm14 = vcmp.eq.s32.totalorder %v1004_v50, 1  ;;  %v1052_v58 = vrot.slane %v992_v48, %v1003_v45  ;;  %v1048_v10 = vrot.slane %v992_v48, %v1605_v12 }
 0x2cf   : > { %v1030_v55 = vsel %vm1006_vm14, %v1015_v51, %v1026_v52  ;;  %v1029_v56 = vsel %vm1005_vm13, %v1248_v42, %v1249_v44 }
 0x2d0   : > { %v1043_v57 = vmul.f32 %v1039_v53, %v1030_v55  ;;  %v1042_v59 = vmul.f32 %v1035_v54, %v1029_v56 }
 0x2d2   : > { %v1056_v60 = vadd.f32 %v1052_v58, %v1043_v57  ;;  %v1055_v61 = vadd.f32 %v1048_v10, %v1042_v59 }
 0x2d4   : > { %v1058_v62 = vmax.f32 %v1056_v60, 0.0  ;;  %v1057_v0 = vmax.f32 %v1055_v61, 0.0 }
 0x2d6   : > { %1162 = vmatprep.mubr.f32.mxu0 %v1058_v62 }
 0x2d7   : > { %1163 = vmatmul.mubr.f32.vlgmr.msra.gmra.mxu0 %v1057_v0 }
 0x397   : > { %v1297_v1 = vpop.f32.mrf.mxu0 }
 0x399   : > { %v1298_v3 = vpop.f32.mrf.mxu0 }
 0x39a   : > { %v1299_v4 = vadd.f32 %v1298_v3, %v1297_v1 }
 0x39c   : > { %v1165_v6 = vadd.f32 %v1299_v4, %v1250_v2 }
 0x39e   : > { %1169 = vst.msk [vmem:[#allocation8] sm:$0x3] %vm1168_vm15, %v1165_v6 }
 0x39f PF: > { %p1739_p6 = scmp.eq.s32.totalorder %s1228_s12, 1  ;;  %s1419_s14 = smov [#allocation8]  }
 0x3a0   : > { %s1177_s15 = sshll.u32 %s1419_s14, 4  ;;  %s1178_s15 = int_to_ptr.vmem [resolvable:$true] %s1177_s15 }
 0x3a1   : > { %s1360_s16 = scalar_lea.vmem %s1178_s15, 32  ;;  %p1367_p10 = scmp.lt.s32.totalorder %s1178_s15, %s1178_s15 }
 0x3a2   : > { %p1361_p7 = scmp.ne.s32.totalorder %s1178_s15, %s1360_s16  ;;  %p1368_p11 = scmp.lt.s32.totalorder %s1360_s16, %s1360_s16 }
 0x3a4   : > { %p1362_p8 = pnand %p1361_p7, %p1739_p6  ;;  %p1369_p12 = por %p1368_p11, %p1367_p10 }
 0x3a6   : > { %p1363_p9 = pneg %p1362_p8 }
 0x3a8   : > { %p1370_p13 = pnand %p1369_p12, %p1363_p9 }
 0x3aa   : > { %1373 = shalt.err (!%p1370_p13)
}
 0x3ab   : > { %1319 = dma.vmem_to_hbm [thread:$0]  (%p1739_p6), %s1178_s15, 32, %s1772_s9, [#allocation9]  }
 0x3ac   : > { %1397 = dma.done.wait (%p1739_p6), [#allocation9], 32  }
 0x3ad   : > { %1399 = vsyncadd (%p1739_p6), [#allocation9], 4294967264 }
 0x3ae PF: > { %s20_s11 = sadd.s32 1, %s1410_s11   ;;  %s1776_s30 = smov %s1406_s10 }
 0x3af   : > { %p17_p0 = scmp.ge.s32.totalorder %s20_s11, 4   ;;  %s1777_s10 = smov %s1779_s13 }
 0x3b1   :  { %19 = sbr.rel (!%p17_p0) target bundleno = 2 (0x2), region = 103 }
 0x3b6   :  { %1190 = vsyncpa [#allocation9], 1 }
 0x3b7   :  { %1192 = vsyncpa [#allocation9 + $0x1], 1 }

</bundles_post_ra>
